<compile_context>
chip_gen: v7x
topology: tpu7x:2x2x1
jax: 0.10.0
libtpu: 0.0.40
codegen_flags: <defaults>
</compile_context>

<pallas_src>
import jax
import jax.numpy as jnp
from jax.experimental import pallas as pl
from jax.experimental.pallas import tpu as pltpu


def _causal_conv1d_kernel(x_ref, w0_ref, w1_ref, o_ref, carry_ref):
    # x_ref:  (C_in, TT)   current batch row, current time tile
    # w0_ref: (C_out, C_in) tap applied to x[t-1]
    # w1_ref: (C_out, C_in) tap applied to x[t]
    # o_ref:  (C_out, TT)
    # carry_ref: (C_in, 1) VMEM scratch — last time column of the previous tile
    t = pl.program_id(1)

    @pl.when(t == 0)
    def _():
        # start of a new batch row: the "previous" sample is zero (causal pad)
        carry_ref[...] = jnp.zeros_like(carry_ref)

    x = x_ref[...]                                   # (C_in, TT)
    tt = x.shape[-1]

    # x_prev[:, i] = x[:, i-1]; column 0 comes from the carry (previous tile / zero).
    x_roll = pltpu.roll(x, shift=1, axis=1)          # XLU lane rotation
    lane = jax.lax.broadcasted_iota(jnp.int32, x.shape, dimension=1)
    x_prev = jnp.where(lane == 0, carry_ref[...], x_roll)

    # carry for the next time tile of this batch row
    carry_ref[...] = x[:, tt - 1:tt]

    # Two MXU matmuls with f32 accumulation (C_out, C_in) @ (C_in, TT).
    acc = jnp.dot(w1_ref[...], x, preferred_element_type=jnp.float32)
    acc = acc + jnp.dot(w0_ref[...], x_prev, preferred_element_type=jnp.float32)
    o_ref[...] = acc.astype(o_ref.dtype)


def _pick_time_tile(T, C_in, C_out, itemsize):
    """Largest lane-dense (multiple-of-128) time tile whose double-buffered
    in/out blocks stay well under the v7x scoped-VMEM budget."""
    budget = 8 << 20  # bytes for 2x(x block) + 2x(out block); conservative for 64 MiB VMEM
    best = None
    for tt in (128, 256, 512, 1024, 2048):
        if T % tt == 0 and 2 * tt * (C_in + C_out) * itemsize <= budget:
            best = tt
    # Small / non-multiple-of-128 T: use the full extent (valid BlockSpec).
    return best if best is not None else T


def causal_conv1d(x, weight, *, time_tile=None):
    """x: (B, C_in, T) float32 (NCL).  weight: (C_out, C_in, 2).  Returns (B, C_out, T)."""
    B, C_in, T = x.shape
    C_out, C_in_w, K = weight.shape
    assert C_in_w == C_in and K == 2

    itemsize = jnp.dtype(x.dtype).itemsize
    TT = time_tile if time_tile is not None else _pick_time_tile(T, C_in, C_out, itemsize)
    assert T % TT == 0, "time tile must divide T"
    n_t = T // TT

    w0 = weight[:, :, 0]    # (C_out, C_in), applied to x[t-1]
    w1 = weight[:, :, 1]    # (C_out, C_in), applied to x[t]

    # VMEM working set: double-buffered x/out blocks + both weight blocks + carry.
    vmem_bytes = (2 * (C_in * TT + C_out * TT) + 2 * C_out * C_in + C_in) * itemsize
    vmem_limit = int(min(max(4 * vmem_bytes, 8 << 20), 48 << 20))

    return pl.pallas_call(
        _causal_conv1d_kernel,
        out_shape=jax.ShapeDtypeStruct((B, C_out, T), x.dtype),
        grid=(B, n_t),
        in_specs=[
            # x tile: one batch row (squeezed), all channels, one time tile
            pl.BlockSpec((None, C_in, TT), lambda b, t: (b, 0, t)),
            # weights: whole, constant index map -> fetched once, VMEM-resident
            pl.BlockSpec((C_out, C_in), lambda b, t: (0, 0)),
            pl.BlockSpec((C_out, C_in), lambda b, t: (0, 0)),
        ],
        out_specs=pl.BlockSpec((None, C_out, TT), lambda b, t: (b, 0, t)),
        scratch_shapes=[pltpu.VMEM((C_in, 1), x.dtype)],
        compiler_params=pltpu.CompilerParams(
            # batch axis parallel (v7x 2 TCs); time axis sequential (causal carry)
            dimension_semantics=("parallel", "arbitrary"),
            vmem_limit_bytes=vmem_limit,
        ),
    )(x, w0, w1)


def _reference(x, weight):
    """Pure-JAX reference of the same causal conv."""
    x_prev = jnp.concatenate([jnp.zeros_like(x[:, :, :1]), x[:, :, :-1]], axis=2)
    return (jnp.einsum('oc,bct->bot', weight[:, :, 0], x_prev)
            + jnp.einsum('oc,bct->bot', weight[:, :, 1], x))


if __name__ == "__main__":
    # (B, C_in, C_out, T): second config uses two time tiles to exercise the
    # cross-tile causal carry.
    configs = [(2, 8, 16, 128), (2, 8, 16, 256)]

    key = jax.random.PRNGKey(0)
    for (B, C_in, C_out, T) in configs:
        key, kx, kw = jax.random.split(key, 3)

        # torch.nn.Conv1d default init: uniform in +/- 1/sqrt(C_in * kernel_size)
        bound = float((C_in * 2) ** -0.5)
        weight = jax.random.uniform(kw, (C_out, C_in, 2), jnp.float32,
                                    minval=-bound, maxval=bound)
        x = jax.random.normal(kx, (B, C_in, T), jnp.float32)

        y = jax.block_until_ready(causal_conv1d(x, weight))
        y_ref = _reference(x, weight)

        assert y.shape == (B, C_out, T)
        assert jnp.allclose(y, y_ref, atol=1e-5, rtol=1e-5), (B, C_in, C_out, T)

    print("KERNEL_OK")
</pallas_src>

<mosaic_0001>
module attributes {stable_mosaic.version = 11 : i64} {
  func.func @_causal_conv1d_kernel(%arg0: i32, %arg1: i32, %arg2: memref<1x8x128xf32, #tpu.memory_space<vmem>>, %arg3: memref<16x8xf32, #tpu.memory_space<vmem>>, %arg4: memref<16x8xf32, #tpu.memory_space<vmem>>, %arg5: memref<1x16x128xf32, #tpu.memory_space<vmem>>, %arg6: memref<8x1xf32, #tpu.memory_space<vmem>>) attributes {dimension_semantics = [#tpu.dimension_semantics<parallel>, #tpu.dimension_semantics<arbitrary>], iteration_bounds = array<i64: 2, 1>, scalar_prefetch = 0 : i64, scratch_operands = 1 : i64, tpu.core_type = #tpu.core_type<tc>, window_params = [{transform_indices = @transform_0, window_bounds = array<i64: 1, 8, 128>}, {pipeline_mode = #tpu.pipeline_mode<synchronous>, transform_indices = @transform_1, window_bounds = array<i64: 16, 8>}, {pipeline_mode = #tpu.pipeline_mode<synchronous>, transform_indices = @transform_2, window_bounds = array<i64: 16, 8>}, {transform_indices = @transform_3, window_bounds = array<i64: 1, 16, 128>}]} {
    %c0_i32 = arith.constant 0 : i32
    %0 = arith.cmpi eq, %arg1, %c0_i32 : i32
    %1 = arith.extui %0 : i1 to i32
    %c0_i32_0 = arith.constant 0 : i32
    %2 = arith.cmpi ne, %1, %c0_i32_0 : i32
    scf.if %2 {
      %cst_16 = arith.constant 0.000000e+00 : f32
      %23 = vector.broadcast %cst_16 : f32 to vector<8x1xf32>
      %c0_17 = arith.constant 0 : index
      %c0_18 = arith.constant 0 : index
      %24 = vector.load %arg6[%c0_17, %c0_18] : memref<8x1xf32, #tpu.memory_space<vmem>>, vector<8x1xf32>
      tpu.vector_store %arg6[%c0_17, %c0_18], %23 {strides = array<i32>} : memref<8x1xf32, #tpu.memory_space<vmem>>, vector<8x1xf32>,
    } else {
    }
    %c0 = arith.constant 0 : index
    %c0_1 = arith.constant 0 : index
    %c0_2 = arith.constant 0 : index
    %3 = vector.load %arg2[%c0, %c0_1, %c0_2] : memref<1x8x128xf32, #tpu.memory_space<vmem>>, vector<1x8x128xf32>
    %4 = vector.shape_cast %3 : vector<1x8x128xf32> to vector<8x128xf32>
    %c1_i32 = arith.constant 1 : i32
    %5 = tpu.dynamic_rotate %4 by %c1_i32 dim 1 : vector<8x128xf32>, i32 -> vector<8x128xf32>
    %6 = tpu.iota {dimensions = array<i32: 1>} : vector<8x128xi32>
    %c0_i32_3 = arith.constant 0 : i32
    %7 = vector.broadcast %c0_i32_3 : i32 to vector<8x128xi32>
    %8 = arith.cmpi eq, %6, %7 : vector<8x128xi32>
    %c0_4 = arith.constant 0 : index
    %c0_5 = arith.constant 0 : index
    %9 = vector.load %arg6[%c0_4, %c0_5] : memref<8x1xf32, #tpu.memory_space<vmem>>, vector<8x1xf32>
    %10 = vector.shape_cast %9 : vector<8x1xf32> to vector<8x1xf32>
    %11 = vector.broadcast %10 : vector<8x1xf32> to vector<8x128xf32>
    %12 = arith.select %8, %11, %5 : vector<8x128xi1>, vector<8x128xf32>
    %13 = vector.extract_strided_slice %4 {offsets = [0, 127], sizes = [8, 1], strides = [1, 1]} : vector<8x128xf32> to vector<8x1xf32>
    %c0_6 = arith.constant 0 : index
    %c0_7 = arith.constant 0 : index
    %14 = vector.load %arg6[%c0_6, %c0_7] : memref<8x1xf32, #tpu.memory_space<vmem>>, vector<8x1xf32>
    tpu.vector_store %arg6[%c0_6, %c0_7], %13 {strides = array<i32>} : memref<8x1xf32, #tpu.memory_space<vmem>>, vector<8x1xf32>,
    %c0_8 = arith.constant 0 : index
    %c0_9 = arith.constant 0 : index
    %15 = vector.load %arg4[%c0_8, %c0_9] : memref<16x8xf32, #tpu.memory_space<vmem>>, vector<16x8xf32>
    %cst = arith.constant dense<0.000000e+00> : vector<16x128xf32>
    %16 = tpu.matmul %15, %4, %cst {dimension_numbers = #tpu.dot_dimension_numbers<[1], [0], [0], [1], [0, 0, 1, 1], [], []>} : vector<16x8xf32>, vector<8x128xf32>, vector<16x128xf32> -> vector<16x128xf32>
    %c0_10 = arith.constant 0 : index
    %c0_11 = arith.constant 0 : index
    %17 = vector.load %arg3[%c0_10, %c0_11] : memref<16x8xf32, #tpu.memory_space<vmem>>, vector<16x8xf32>
    %cst_12 = arith.constant dense<0.000000e+00> : vector<16x128xf32>
    %18 = tpu.matmul %17, %12, %cst_12 {dimension_numbers = #tpu.dot_dimension_numbers<[1], [0], [0], [1], [0, 0, 1, 1], [], []>} : vector<16x8xf32>, vector<8x128xf32>, vector<16x128xf32> -> vector<16x128xf32>
    %19 = arith.addf %16, %18 : vector<16x128xf32>
    %c0_13 = arith.constant 0 : index
    %c0_14 = arith.constant 0 : index
    %c0_15 = arith.constant 0 : index
    %20 = vector.load %arg5[%c0_13, %c0_14, %c0_15] : memref<1x16x128xf32, #tpu.memory_space<vmem>>, vector<1x16x128xf32>
    %21 = vector.shape_cast %20 : vector<1x16x128xf32> to vector<16x128xf32>
    %22 = vector.shape_cast %19 : vector<16x128xf32> to vector<1x16x128xf32>
    tpu.vector_store %arg5[%c0_13, %c0_14, %c0_15], %22 {strides = array<i32>} : memref<1x16x128xf32, #tpu.memory_space<vmem>>, vector<1x16x128xf32>,
    return
  }
  func.func @transform_0(%arg0: i32, %arg1: i32) -> (i32, i32, i32) {
    %c0_i32 = arith.constant 0 : i32
    %c0_i32_0 = arith.constant 0 : i32
    return %arg0, %c0_i32, %arg1 : i32, i32, i32
  }
  func.func @transform_1(%arg0: i32, %arg1: i32) -> (i32, i32) {
    %c0_i32 = arith.constant 0 : i32
    %c0_i32_0 = arith.constant 0 : i32
    %c0_i32_1 = arith.constant 0 : i32
    return %c0_i32, %c0_i32_0 : i32, i32
  }
  func.func @transform_2(%arg0: i32, %arg1: i32) -> (i32, i32) {
    %c0_i32 = arith.constant 0 : i32
    %c0_i32_0 = arith.constant 0 : i32
    %c0_i32_1 = arith.constant 0 : i32
    return %c0_i32, %c0_i32_0 : i32, i32
  }
  func.func @transform_3(%arg0: i32, %arg1: i32) -> (i32, i32, i32) {
    %c0_i32 = arith.constant 0 : i32
    %c0_i32_0 = arith.constant 0 : i32
    return %arg0, %c0_i32, %arg1 : i32, i32, i32
  }
}

</mosaic_0001>

<bundles_post_ra>
// kernel: tpu_custom_call.1
= control target key start
LH: loop header
LB: loop body
LE: loop exit
PB: predicated region body
PF: predicated region fallthrough
CT: control target
= control target key end

     0   :  { %8 = vsyncpa [#allocation4], 0  ;;  %s806_s0 = inlined_call_operand.vmem [shape: f32[2,8,128], index: 0, kind: input, shape index: {}]   ;;  %s807_s1 = inlined_call_operand.vmem [shape: f32[16,8], index: 1, kind: input, shape index: {}]   ;;  %s808_s2 = inlined_call_operand.vmem [shape: f32[16,8], index: 2, kind: input, shape index: {}]   ;;  %s809_s3 = inlined_call_operand.hbm [shape: f32[2,16,128], index: 3, kind: output, shape index: {}]  }
   0x1   :  { %10 = vsyncpa [#allocation4 + $0x1], 0  ;;  %s677_s12 = smov 0   ;;  %s679_s13 = smov 0  }
   0x2   :  { %s681_s14 = smov 0   ;;  %s683_s15 = smov 0  }
   0x3   :  { %s685_s16 = smov 0   ;;  %s687_s17 = smov 0  }
   0x4 LB: > { %s475_s18 = sadd.s32 4294967295, %s649_s17   ;;  %s476_s19 = sadd.s32 4294967294, %s649_s17   ;;  %s649_s17 = sphi %s687_s17, %s16_s17   ;;  %s645_s16 = sphi %s685_s16, %s816_s16   ;;  %s641_s15 = sphi %s683_s15, %s815_s15   ;;  %s637_s14 = sphi %s681_s14, %s814_s14   ;;  %s633_s13 = sphi %s679_s13, %s813_s13   ;;  %s629_s12 = sphi %s677_s12, %s812_s12  }
   0x5   : > { %s28_s20 = sadd.s32 1, %s645_s16  ;;  %s107_s21 = sadd.s32 1, %s637_s14 }
   0x6   : > { %p30_p0 = scmp.ge.s32.totalorder %s28_s20, 2  ;;  %p117_p1 = scmp.ne.s32.totalorder %s637_s14, %s633_s13 }
   0x7   : > { %p118_p2 = scmp.eq.s32.totalorder %s475_s18, 1  ;;  %p123_p3 = scmp.ne.s32.totalorder %s633_s13, %s629_s12 }
   0x8   : > { %s818_s20 = smov (%p30_p0, %s28_s20), 0  ;;  %p124_p5 = scmp.eq.s32.totalorder %s476_s19, 1 }
   0x9   : > { %p717_p4 = por %p118_p2, %p117_p1  ;;  %s102_s23 = ssub.s32 %s645_s16, %s818_s20 }
   0xa   : > { %p479_p6 = scmp.ge.s32.totalorder %s649_s17, 1  ;;  %p105_p7 = scmp.eq.s32.totalorder %s102_s23, 0 }
   0xb   : > { %p724_p8 = por %p124_p5, %p123_p3  ;;  %p158_p9 = scmp.lt.s32.totalorder %s649_s17, 3 }
   0xc   : > { %s730_s25 = scalar_select %p105_p7, %s637_s14, %s107_s21  }
   0xd   : > { %p159_p10 = pnand %p479_p6, %p158_p9 }
   0xe   : > { %vm195_vm0 = vcmask (!%p159_p10), 7168   ;;  %p184_p11 = scmp.lt.s32.totalorder (!%p159_p10), %s641_s15, 1  ;;  %v651_v0 = vmov (!%p159_p10), 0   ;;  %v652_v1 = vmov (!%p159_p10), 0.0   ;;  %s653_s4 = smov (!%p159_p10), 1   ;;  %v216_v4 = vld [vmem:[%s808_s2] sm:$0xff] (!%p159_p10)  ;;  %v200_v7 = vlaneseq (!%p159_p10) }
   0xf   : > { %162 = sbr.rel (%p159_p10) target bundleno = 388 (0x184), region = 32  ;;  %570 = vset.pattern.permute.xlu0 (!%p159_p10), %v651_v0  ;;  %196 = vst.msk [vmem:[#allocation2] sm:$0xff] (!%p159_p10), %vm195_vm0, %v652_v1  ;;  %vm220_vm1 = vcmask (!%p159_p10), 64512   ;;  %v218_v5 = vld [vmem:[%s807_s1] sm:$0xff] (!%p159_p10)  ;;  %v217_v6 = vld [vmem:[%s808_s2 + $0x8] sm:$0xff] (!%p159_p10)  ;;  %s181_s19 = sand.u32 (!%p159_p10), 1, %s633_s13  }
  0x10   : > { %505 = vmatprep.mubr.msk.f32.mxu0 (!%p159_p10), %vm220_vm1, %v216_v4  ;;  %500 = vmatprep.mubr.msk.f32.mxu1 (!%p159_p10), %vm220_vm1, %v218_v5  ;;  %v201_v8 = vand.u32 (!%p159_p10), 127, %v200_v7  ;;  %v219_v12 = vld [vmem:[%s807_s1 + $0x8] sm:$0xff] (!%p159_p10)  ;;  %s480_s21 = sshll.u32 (!%p159_p10), %s181_s19, 4 }
  0x11   : > { %s183_s23 = scalar_lea.vmem (!%p159_p10), [#allocation3], %s480_s21 }
  0x12   : > { %vm202_vm2 = vcmp.eq.s32.totalorder (!%p159_p10), %v201_v8, 0 }
  0x16   : > { %s185_s26 = scalar_select %p184_p11, %s641_s15, 1  ;;  %v203_v3 = vld [vmem:[#allocation2] sm:$0xff] }
  0x17   : > { %206 = vperm.xlu0 %570, %v203_v3  }
  0x18   : > { %s481_s27 = sshll.u32 %s185_s26, 3  ;;  %s400_s26 = sshll.u32 %s183_s23, 4  ;;  %s753_s26 = int_to_ptr.vmem [resolvable:$true] %s400_s26 }
  0x19   : > { %s190_s30 = scalar_lea.vmem %s806_s0, %s481_s27  ;;  %s491_s27 = sshll.u32 %s641_s15, 8 }
  0x1a   : > { %v197_v2 = vld [vmem:[%s190_s30] sm:$0xff]  ;;  %s758_s30 = scalar_lea.hbm %s809_s3, %s491_s27  ;;  %s571_s5 = scalar_lea.vmem %s753_s26, 256 }
  0x1b   : > { %503 = vmatprep.subr.mxu0 %v197_v2  ;;  %211 = vrot.lane.b32.xlu1 %v197_v2, %s653_s4  ;;  %p572_p12 = scmp.ne.s32.totalorder %s753_s26, %s571_s5  ;;  %s654_s15 = smov [#allocation3]  }
  0x1c   : > { %504 = vmatpush3.msra.mxu0 %v197_v2  ;;  %198 = vrot.lane.b32.xlu0 %v197_v2, %s653_s4  ;;  %s760_s4 = scalar_lea.sflag [#allocation4], %s181_s19  ;;  %s575_s6 = sshll.u32 %s654_s15, 4  ;;  %s576_s6 = int_to_ptr.vmem [resolvable:$false] %s575_s6 }
  0x1d   : > { %506 = vmatmul.mubr.msk.f32.vlgmr.msra.gmra.mrb[0].mxu0 %vm220_vm1, %v217_v6  ;;  %p573_p13 = pnand %p572_p12, %p717_p4  ;;  %s577_s7 = scalar_lea.vmem %s576_s6, 512 }
  0x1e   : > { %p578_p1 = scmp.lt.s32.totalorder %s753_s26, %s576_s6  ;;  %p579_p2 = scmp.lt.s32.totalorder %s577_s7, %s571_s5 }
  0x1f   : > { %p574_p0 = pneg %p573_p13 }
  0x20   : > { %p580_p3 = por %p579_p2, %p578_p1 }
  0x22   : > { %p581_p5 = pnand %p580_p3, %p574_p0 }
  0x8d   : > { %v212_v15 = vpop.permute.xlu1 %211 }
  0x8e   : > { %215 = vst.msk [vmem:[#allocation2] sm:$0xff] %vm195_vm0, %v212_v15 }
  0x96   : > { %v207_v9 = vpop.permute.xlu0 %206 }
  0x9a   : > { %v199_v10 = vpop.permute.xlu0 %198 }
  0x9b   : > { %v209_v11 = vsel %vm202_vm2, %v207_v9, %v199_v10 }
  0x9c   : > { %498 = vmatprep.subr.mxu1 %v209_v11 }
  0x9d   : > { %499 = vmatpush3.msra.mxu1 %v209_v11 }
  0x9e   : > { %501 = vmatmul.mubr.msk.f32.vlgmr.msra.gmra.mrb[0].mxu1 %vm220_vm1, %v219_v12 }
  0xf0   : > { %v507_v13 = vpop.f32.mrb[0].mxu0 }
  0xf1   : > { %v374_v14 = vpop.f32.mrb[1].mxu0 }
 0x171   : > { %v502_v16 = vpop.f32.mrb[0].mxu1 }
 0x172   : > { %v380_v17 = vadd.f32 %v507_v13, %v502_v16  ;;  %v293_v18 = vpop.f32.mrb[1].mxu1 }
 0x173   : > { %v375_v19 = vadd.f32 %v374_v14, %v293_v18 }
 0x174   : > { %384 = vst [vmem:[%s183_s23 + $0x8] sm:$0xff] %v380_v17 }
 0x175   : > { %383 = vst [vmem:[%s183_s23] sm:$0xff] %v375_v19 }
 0x176   : > { %584 = shalt.err (!%p581_p5)
}
 0x177   : > { %s585_s8 = scalar_lea.hbm %s758_s30, 256  ;;  %s589_s11 = scalar_lea.hbm %s809_s3, 512 }
 0x178   : > { %p586_p6 = scmp.ne.s32.totalorder %s758_s30, %s585_s8  ;;  %p590_p10 = scmp.lt.u32.totalorder %s758_s30, %s809_s3 }
 0x179   : > { %p591_p11 = scmp.lt.u32.totalorder %s589_s11, %s585_s8  ;;  %p593_p13 = scmp.lt.u32.totalorder %s585_s8, %s758_s30 }
 0x17a   : > { %p587_p7 = pnand %p586_p6, %p717_p4 }
 0x17b   : > { %p592_p12 = por %p591_p11, %p590_p10 }
 0x17c   : > { %p588_p9 = pneg %p587_p7 }
 0x17d   : > { %p594_p0 = por %p593_p13, %p592_p12 }
 0x17f   : > { %p595_p1 = pnand %p594_p0, %p588_p9 }
 0x181   : > { %598 = shalt.err (!%p595_p1)
}
 0x182   : > { %s655_s21 = smov 128   ;;  %s656_s23 = smov 8  }
 0x183   : > { %510 = dma.vmem_to_hbm [thread:$0]  (%p717_p4), %s753_s26, 256, %s758_s30, %s760_s4, %s655_s21, %s655_s21, %s656_s23  }
 0x184 PF: > { %p516_p2 = scmp.ge.s32.totalorder %s649_s17, 2  ;;  %s415_s27 = sand.u32 1, %s629_s12  }
 0x185   : > { %s416_s28 = scalar_lea.sflag [#allocation4], %s415_s27 }
 0x186   : > { %p513_p3 = pnand %p516_p2, %p724_p8 }
 0x188   : > { %624 = dma.done.wait (!%p513_p3), %s416_s28, 256  }
 0x189   : > { %626 = vsyncadd (!%p513_p3), %s416_s28, 4294967040  ;;  %s16_s17 = sadd.s32 1, %s649_s17   ;;  %s812_s12 = smov %s633_s13 }
 0x18a   : > { %p13_p5 = scmp.ge.s32.totalorder %s16_s17, 4   ;;  %s813_s13 = smov %s637_s14 }
 0x18b   : > { %s814_s14 = smov %s730_s25  ;;  %s815_s15 = smov %s645_s16 }
 0x18c   : > { %s816_s16 = smov %s818_s20  ;;  %15 = sbr.rel (!%p13_p5) target bundleno = 4 (0x4), region = 71 }
 0x193   :  { %421 = vsyncpa [#allocation4], 1 }
 0x194   :  { %423 = vsyncpa [#allocation4 + $0x1], 1 }

</bundles_post_ra>
